<compile_context>
chip_gen: v7x
topology: tpu7x:2x2x1
jax: 0.10.0
libtpu: 0.0.40
codegen_flags: <defaults>
</compile_context>

<pallas_src>
import jax
import jax.numpy as jnp
from jax.experimental import pallas as pl
from jax.experimental.pallas import tpu as pltpu


def _round_up(x, m):
    return ((x + m - 1) // m) * m


def _perceptron_kernel(x_ref, w_ref, b_ref, o_ref):
    # x_ref: (TB, D) VMEM tile, w_ref: (1, D) VMEM (resident across the grid),
    # b_ref: (1,) SMEM scalar, o_ref: (1, TB) lane-dense VMEM output tile.
    # logits[0, j] = sum_d w[0, d] * x[j, d] + b  computed as a single MXU dot
    # whose (1, TB) result is already lane-major -> unmasked full-lane stores.
    logits = jax.lax.dot_general(
        w_ref[...], x_ref[...],
        dimension_numbers=(((1,), (1,)), ((), ())),
        preferred_element_type=jnp.float32,
    ) + b_ref[0]
    o_ref[...] = jax.nn.sigmoid(logits).astype(o_ref.dtype)


def _vmem_budget():
    """Generation-aware (target_tile_bytes, vmem_limit_bytes)."""
    try:
        cap = pltpu.get_tpu_info().vmem_capacity_bytes
    except Exception:
        cap = 64 << 20  # conservative (v7x-sized) fallback if the query fails
    if cap >= (100 << 20):        # v5e / v6e: 128 MiB physical VMEM
        return 24 << 20, 96 << 20
    return 16 << 20, 48 << 20     # v7x: 64 MiB physical VMEM


def _choose_batch_tile(batch, feat_dim, itemsize, target_tile_bytes):
    """Row-tile size for x.

    Footprint uses the lane-padded width (D rounded to 128).  The tile is a
    multiple of 128 rows so the lane-dense (1, TB) output block is always a
    legal BlockSpec, and for batch >= 256 we force >= 2 grid steps so v7x's
    two TensorCores both get work.  Small batches collapse to a single
    full-array block (block dims == array dims is always legal).
    """
    d_pad = _round_up(feat_dim, 128)           # Mosaic pads the lane dim to 128
    row_bytes = d_pad * itemsize
    tb = (target_tile_bytes // row_bytes) // 128 * 128
    tb = max(tb, 128)
    if batch >= 256:                           # keep the 2nd TC busy on v7x
        tb = min(tb, _round_up(pl.cdiv(batch, 2), 128))
    if batch <= tb:                            # single tile: block == full dims
        tb = batch
    return tb


def perceptron_forward(x, weight, bias):
    """Pallas equivalent of sigmoid(nn.Linear(D, 1)(x)).squeeze().

    x: (B, D), weight: (1, D) or (D,), bias: (1,) or scalar.
    Returns shape (B,) float32 (0-d scalar when B == 1, matching .squeeze()).
    """
    B, D = x.shape
    w2d = jnp.asarray(weight).reshape(1, D).astype(x.dtype)
    b1d = jnp.asarray(bias, dtype=jnp.float32).reshape(1)

    target_tile_bytes, vmem_limit = _vmem_budget()
    tb = _choose_batch_tile(B, D, x.dtype.itemsize, target_tile_bytes)
    grid = (pl.cdiv(B, tb),)

    cost = pl.CostEstimate(
        flops=2 * B * D,
        transcendentals=B,                                    # one sigmoid/row
        bytes_accessed=B * D * x.dtype.itemsize
        + D * w2d.dtype.itemsize + B * 4 + 4,
    )

    out = pl.pallas_call(
        _perceptron_kernel,
        out_shape=jax.ShapeDtypeStruct((1, B), jnp.float32),
        grid_spec=pltpu.PrefetchScalarGridSpec(
            num_scalar_prefetch=0,
            grid=grid,
            in_specs=[
                pl.BlockSpec((tb, D), lambda i: (i, 0)),             # x row tiles
                pl.BlockSpec((1, D), lambda i: (0, 0)),              # w: resident
                pl.BlockSpec(memory_space=pltpu.MemorySpace.SMEM),   # bias scalar
            ],
            out_specs=pl.BlockSpec((1, tb), lambda i: (0, i)),       # lane-dense
        ),
        compiler_params=pltpu.CompilerParams(
            dimension_semantics=("parallel",),   # independent rows -> v7x 2 TCs
            vmem_limit_bytes=vmem_limit,
        ),
        cost_estimate=cost,
    )(x, w2d, b1d)

    # torch .squeeze(): (1, B) -> (B,)   (and () when B == 1)
    return jnp.squeeze(out)


if __name__ == "__main__":
    key = jax.random.PRNGKey(0)
    batch, input_dim = 8, 32

    kx, kw, kb = jax.random.split(key, 3)
    x = jax.random.normal(kx, (batch, input_dim), dtype=jnp.float32)

    # Deterministic nn.Linear-style init: U(-1/sqrt(D), 1/sqrt(D))
    bound = 1.0 / jnp.sqrt(jnp.float32(input_dim))
    weight = jax.random.uniform(kw, (1, input_dim), minval=-bound, maxval=bound,
                                dtype=jnp.float32)
    bias = jax.random.uniform(kb, (1,), minval=-bound, maxval=bound,
                              dtype=jnp.float32)

    def ref_fwd(xi):
        # exact f32 reference (VPU reduce, no matmul-precision ambiguity)
        return jax.nn.sigmoid(jnp.sum(xi * weight, axis=-1) + bias[0])

    y = jax.block_until_ready(perceptron_forward(x, weight, bias))
    assert y.shape == (batch,)
    assert jnp.allclose(y, ref_fwd(x), atol=1e-5, rtol=1e-5)

    # batch not a multiple of 8: single full-array block (block == array dims).
    x2 = jax.random.normal(jax.random.PRNGKey(1), (50, input_dim),
                           dtype=jnp.float32)
    y2 = jax.block_until_ready(perceptron_forward(x2, weight, bias))
    assert y2.shape == (50,)
    assert jnp.allclose(y2, ref_fwd(x2), atol=1e-5, rtol=1e-5)

    # batch large enough to exercise a multi-step grid + partial last tile with
    # the lane-dense (1, B) output layout.
    x3 = jax.random.normal(jax.random.PRNGKey(2), (300, input_dim),
                           dtype=jnp.float32)
    y3 = jax.block_until_ready(perceptron_forward(x3, weight, bias))
    assert y3.shape == (300,)
    assert jnp.allclose(y3, ref_fwd(x3), atol=1e-5, rtol=1e-5)

    print("KERNEL_OK")
</pallas_src>

<mosaic_0001>
module attributes {stable_mosaic.version = 11 : i64} {
  func.func @_perceptron_kernel(%arg0: i32, %arg1: memref<8x32xf32, #tpu.memory_space<vmem>>, %arg2: memref<1x32xf32, #tpu.memory_space<vmem>>, %arg3: memref<1xf32, #tpu.memory_space<smem>>, %arg4: memref<1x8xf32, #tpu.memory_space<vmem>>) attributes {dimension_semantics = [#tpu.dimension_semantics<parallel>], iteration_bounds = array<i64: 1>, scalar_prefetch = 0 : i64, scratch_operands = 0 : i64, tpu.core_type = #tpu.core_type<tc>, window_params = [{transform_indices = @transform_0, window_bounds = array<i64: 8, 32>}, {pipeline_mode = #tpu.pipeline_mode<synchronous>, transform_indices = @transform_1, window_bounds = array<i64: 1, 32>}, {transform_indices = @transform_2, window_bounds = array<i64: 1>}, {transform_indices = @transform_3, window_bounds = array<i64: 1, 8>}]} {
    %c0 = arith.constant 0 : index
    %c0_0 = arith.constant 0 : index
    %0 = vector.load %arg2[%c0, %c0_0] : memref<1x32xf32, #tpu.memory_space<vmem>>, vector<1x32xf32>
    %c0_1 = arith.constant 0 : index
    %c0_2 = arith.constant 0 : index
    %1 = vector.load %arg1[%c0_1, %c0_2] : memref<8x32xf32, #tpu.memory_space<vmem>>, vector<8x32xf32>
    %cst = arith.constant dense<0.000000e+00> : vector<1x8xf32>
    %2 = tpu.matmul %0, %1, %cst {dimension_numbers = #tpu.dot_dimension_numbers<[1], [1], [0], [0], [0, 0, 1, 0], [], []>} : vector<1x32xf32>, vector<8x32xf32>, vector<1x8xf32> -> vector<1x8xf32>
    %c0_3 = arith.constant 0 : index
    %3 = memref.load %arg3[%c0_3] : memref<1xf32, #tpu.memory_space<smem>>
    %4 = vector.broadcast %3 : f32 to vector<1x8xf32>
    %5 = arith.addf %2, %4 : vector<1x8xf32>
    %6 = arith.negf %5 : vector<1x8xf32>
    %7 = math.exp %6 : vector<1x8xf32>
    %cst_4 = arith.constant 1.000000e+00 : f32
    %8 = vector.broadcast %cst_4 : f32 to vector<1x8xf32>
    %9 = arith.addf %8, %7 : vector<1x8xf32>
    %10 = arith.divf %8, %9 : vector<1x8xf32>
    %c0_5 = arith.constant 0 : index
    %c0_6 = arith.constant 0 : index
    %11 = vector.load %arg4[%c0_5, %c0_6] : memref<1x8xf32, #tpu.memory_space<vmem>>, vector<1x8xf32>
    tpu.vector_store %arg4[%c0_5, %c0_6], %10 {strides = array<i32>} : memref<1x8xf32, #tpu.memory_space<vmem>>, vector<1x8xf32>,
    return
  }
  func.func @transform_0(%arg0: i32) -> (i32, i32) {
    %c0_i32 = arith.constant 0 : i32
    %c0_i32_0 = arith.constant 0 : i32
    return %arg0, %c0_i32 : i32, i32
  }
  func.func @transform_1(%arg0: i32) -> (i32, i32) {
    %c0_i32 = arith.constant 0 : i32
    %c0_i32_0 = arith.constant 0 : i32
    %c0_i32_1 = arith.constant 0 : i32
    return %c0_i32, %c0_i32_0 : i32, i32
  }
  func.func @transform_2(%arg0: i32) -> i32 {
    %c0_i32 = arith.constant 0 : i32
    %c0_i32_0 = arith.constant 0 : i32
    return %c0_i32 : i32
  }
  func.func @transform_3(%arg0: i32) -> (i32, i32) {
    %c0_i32 = arith.constant 0 : i32
    %c0_i32_0 = arith.constant 0 : i32
    return %c0_i32, %arg0 : i32, i32
  }
}

</mosaic_0001>

<bundles_post_ra>
// kernel: tpu_custom_call.1
= control target key start
LH: loop header
LB: loop body
LE: loop exit
PB: predicated region body
PF: predicated region fallthrough
CT: control target
= control target key end

     0   :  { %9 = vsyncpa [#allocation4], 0  ;;  %s252_s0 = inlined_call_operand.hbm [shape: f32[8,32], index: 0, kind: input, shape index: {}]   ;;  %s253_s1 = inlined_call_operand.vmem [shape: f32[1,32], index: 1, kind: input, shape index: {}]   ;;  %s254_s2 = inlined_call_operand.<no memory space> [shape: f32[1], index: 2, kind: input, shape index: {}]   ;;  %s255_s3 = inlined_call_operand.hbm [shape: f32[1,8], index: 3, kind: output, shape index: {}]  }
   0x1   :  { %10 = vsyncpa [#allocation5], 0  ;;  %s198_s12 = smov [#allocation3]   ;;  %s150_s16 = scalar_lea.hbm %s252_s0, 128 }
   0x2   :  { %s17_s13 = sshll.u32 %s198_s12, 4  ;;  %p151_p0 = scmp.ne.s32.totalorder %s252_s0, %s150_s16  ;;  %s18_s13 = int_to_ptr.vmem [resolvable:$true] %s17_s13 }
   0x3   :  { %p154_p1 = scmp.lt.u32.totalorder %s150_s16, %s252_s0 }
   0x5   :  { %p156_p2 = pnand %p154_p1, %p151_p0 }
   0x7   :  { %159 = shalt.err (!%p156_p2)
}
   0x8   :  { %s160_s21 = scalar_lea.vmem %s18_s13, 128  ;;  %p165_p4 = scmp.lt.s32.totalorder %s18_s13, %s18_s13 }
   0x9   :  { %p161_p3 = scmp.ne.s32.totalorder %s18_s13, %s160_s21  ;;  %p166_p5 = scmp.lt.s32.totalorder %s160_s21, %s160_s21 }
   0xb   :  { %p167_p6 = por %p166_p5, %p165_p4 }
   0xd   :  { %p168_p7 = pnand %p167_p6, %p161_p3 }
   0xf   :  { %171 = shalt.err (!%p168_p7)
}
  0x10   :  { %20 = dma.hbm_to_vmem [thread:$0]  %s252_s0, 128, %s18_s13, [#allocation4]  }
  0x11   :  { %194 = dma.done.wait [#allocation4], 128  }
  0x12   :  { %195 = vsyncadd [#allocation4], 4294967168  ;;  %v199_v0 = vmov 0.0   ;;  %vm200_vm0 = vmmov 0   ;;  %vm32_vm1 = vcmask 261120   ;;  %v29_v1 = vld [vmem:[#allocation3] sm:$0xff]  ;;  %v31_v3 = vstv %s254_s2 }
  0x13   :  { %137 = vmatprep.subr.mxu0 %v199_v0  ;;  %139 = vmatprep.mubr.msk.f32.mxu0 %vm200_vm0, %v199_v0  ;;  %v28_v2 = vld [vmem:[%s253_s1] sm:$0x1]  ;;  %s201_s0 = smov [#allocation6]   ;;  %vm115_vm2 = vcmask 57344  }
  0x14   :  { %138 = vmatpush3.xpose.msk.msra.mxu0 %vm32_vm1, %v29_v1  ;;  %s123_s28 = sshll.u32 %s201_s0, 4  ;;  %s124_s28 = int_to_ptr.vmem [resolvable:$true] %s123_s28 }
  0x15   :  { %s172_s1 = scalar_lea.vmem %s124_s28, 16  ;;  %s176_s29 = scalar_lea.vmem %s124_s28, 32 }
  0x16   :  { %p173_p8 = scmp.ne.s32.totalorder %s124_s28, %s172_s1  ;;  %p177_p9 = scmp.lt.s32.totalorder %s124_s28, %s124_s28 }
  0x17   :  { %140 = vmatmul.mubr.msk.f32.vlgmr.msra.gmra.mrb[0].mxu0 %vm32_vm1, %v28_v2  ;;  %p178_p10 = scmp.lt.s32.totalorder %s176_s29, %s172_s1 }
  0x19   :  { %p179_p11 = por %p178_p10, %p177_p9 }
  0x1b   :  { %p180_p12 = pnand %p179_p11, %p173_p8 }
  0xea   :  { %v105_v4 = vpop.f32.mrb[0].mxu0 }
  0xeb   :  { %v106_v5 = vadd.f32 %v105_v4, %v31_v3  ;;  %v141_v6 = vpop.f32.mrb[1].mxu0 }
  0xed   :  { %v134_v7 = vmul.f32 -1.442695, %v106_v5 }
  0xef   :  { %146 = vpow2.f32 %v134_v7 }
  0xf9   :  { %v147_v8 = vpop.eup %146 }
  0xfa   :  { %v112_v9 = vadd.f32 1.0, %v147_v8 }
  0xfc   :  { %148 = vrcp.f32 %v112_v9 }
 0x106   :  { %v149_v10 = vpop.eup %148 }
 0x107   :  { %116 = vst.msk [vmem:[#allocation6] sm:$0x1] %vm115_vm2, %v149_v10 }
 0x108   :  { %183 = shalt.err (!%p180_p12)
}
 0x109   :  { %s184_s4 = scalar_lea.hbm %s255_s3, 16 }
 0x10a   :  { %p185_p13 = scmp.ne.s32.totalorder %s255_s3, %s184_s4  ;;  %p188_p0 = scmp.lt.u32.totalorder %s184_s4, %s255_s3 }
 0x10c   :  { %p190_p1 = pnand %p188_p0, %p185_p13 }
 0x10e   :  { %193 = shalt.err (!%p190_p1)
}
 0x10f   :  { %126 = dma.vmem_to_hbm [thread:$0]  %s124_s28, 16, %s255_s3, [#allocation5]  }
 0x110   :  { %196 = dma.done.wait [#allocation5], 16  }
 0x111   :  { %197 = vsyncadd [#allocation5], 4294967280 }
 0x112   :  { %130 = vsyncpa [#allocation4], 1 }
 0x113   :  { %131 = vsyncpa [#allocation5], 1 }

</bundles_post_ra>
